<compile_context>
chip_gen: v7x
topology: tpu7x:2x2x1
jax: 0.10.0
libtpu: 0.0.40
codegen_flags: <defaults>
</compile_context>

<pallas_src>
import jax
import jax.numpy as jnp
from jax.experimental import pallas as pl
from jax.experimental.pallas import tpu as pltpu


def _concat_linear_relu_kernel(l_ref, a_ref, v_ref,
                               wl_ref, wa_ref, wv_ref, b_ref, o_ref):
    # Three MXU matmuls accumulate in f32, then bias + ReLU on the VPU.
    acc = jnp.dot(l_ref[...], wl_ref[...], preferred_element_type=jnp.float32)
    acc = acc + jnp.dot(a_ref[...], wa_ref[...], preferred_element_type=jnp.float32)
    acc = acc + jnp.dot(v_ref[...], wv_ref[...], preferred_element_type=jnp.float32)
    acc = acc + b_ref[...]                      # (1, Np) broadcasts over rows
    o_ref[...] = jnp.maximum(acc, 0.0).astype(o_ref.dtype)


def _round_up(x, m):
    return (x + m - 1) // m * m


def concat_forward(l1, a1, v1, weight, bias, *, bm_max=256):
    """Pallas equivalent of concat.forward(l1, a1, v1).

    l1/a1/v1: (batch, in_size); weight: (output_dim, 3*in_size); bias: (output_dim,)
    """
    assert l1.shape == a1.shape == v1.shape, "input shapes must match"
    assert l1.dtype == a1.dtype == v1.dtype, "input dtypes must match"
    M, K = l1.shape
    N = weight.shape[0]
    assert weight.shape == (N, 3 * K)
    assert bias.shape == (N,)

    # Split the concat-linear weight per modality; transpose to (K, N) so each
    # product is a plain row-major matmul on the MXU. No concat is materialized.
    wl = weight[:, :K].T
    wa = weight[:, K:2 * K].T
    wv = weight[:, 2 * K:].T

    # Lane/sublane-friendly padding: last dims -> multiples of 128 (lane dense,
    # unmasked vst), rows -> multiple of the row tile bm (multiple of 8).
    # Zero-padding K is exact (extra columns contribute 0 to the matmul);
    # padded N / M are sliced off at the end.
    Kp = _round_up(K, 128)
    Np = _round_up(N, 128)
    bm = bm_max if M >= bm_max else _round_up(M, 8)
    Mp = _round_up(M, bm)

    def pad2(x, rows, cols):
        return jnp.pad(x, ((0, rows - x.shape[0]), (0, cols - x.shape[1])))

    lp, ap, vp = (pad2(t, Mp, Kp) for t in (l1, a1, v1))
    wlp, wap, wvp = (pad2(w, Kp, Np) for w in (wl, wa, wv))
    bp = jnp.pad(bias, (0, Np - N)).reshape(1, Np)

    grid = (Mp // bm,)
    x_spec = pl.BlockSpec((bm, Kp), lambda i: (i, 0))     # row tile of each input
    w_spec = pl.BlockSpec((Kp, Np), lambda i: (0, 0))     # weights fully resident
    b_spec = pl.BlockSpec((1, Np), lambda i: (0, 0))
    o_spec = pl.BlockSpec((bm, Np), lambda i: (i, 0))     # lane-dense output tile

    out = pl.pallas_call(
        _concat_linear_relu_kernel,
        out_shape=jax.ShapeDtypeStruct((Mp, Np), l1.dtype),
        grid=grid,
        in_specs=[x_spec, x_spec, x_spec, w_spec, w_spec, w_spec, b_spec],
        out_specs=o_spec,
        compiler_params=pltpu.CompilerParams(
            # Row tiles are independent -> megacore-shardable on v7x.
            dimension_semantics=("parallel",),
        ),
    )(lp, ap, vp, wlp, wap, wvp, bp)

    return out[:M, :N]


def init_concat_params(key, in_size, output_dim):
    """Deterministic init matching nn.Linear(in_size*3, output_dim)."""
    kw, kb = jax.random.split(key)
    fan_in = in_size * 3
    bound = 1.0 / jnp.sqrt(fan_in)
    weight = jax.random.uniform(kw, (output_dim, fan_in), jnp.float32, -bound, bound)
    bias = jax.random.uniform(kb, (output_dim,), jnp.float32, -bound, bound)
    return {"linear_1.weight": weight, "linear_1.bias": bias}


if __name__ == "__main__":
    key = jax.random.PRNGKey(0)
    k_l, k_a, k_v, k_p = jax.random.split(key, 4)

    batch, in_size, output_dim = 2, 32, 8

    params = init_concat_params(k_p, in_size, output_dim)
    W = params["linear_1.weight"]
    b = params["linear_1.bias"]

    l1 = jax.random.normal(k_l, (batch, in_size), dtype=jnp.float32)
    a1 = jax.random.normal(k_a, (batch, in_size), dtype=jnp.float32)
    v1 = jax.random.normal(k_v, (batch, in_size), dtype=jnp.float32)

    y = concat_forward(l1, a1, v1, W, b)
    jax.block_until_ready(y)

    # Reference: relu(cat([l1,a1,v1], -1) @ W.T + b)
    fusion = jnp.concatenate([l1, a1, v1], axis=-1)
    ref = jnp.maximum(fusion @ W.T + b, 0.0)
    assert y.shape == ref.shape, f"shape mismatch {y.shape} vs {ref.shape}"
    assert jnp.allclose(y, ref, atol=1e-5, rtol=1e-5), "mismatch vs reference"

    print("KERNEL_OK")
</pallas_src>

<mosaic_0001>
module attributes {stable_mosaic.version = 11 : i64} {
  func.func @_concat_linear_relu_kernel(%arg0: i32, %arg1: memref<8x128xf32, #tpu.memory_space<vmem>>, %arg2: memref<8x128xf32, #tpu.memory_space<vmem>>, %arg3: memref<8x128xf32, #tpu.memory_space<vmem>>, %arg4: memref<128x128xf32, #tpu.memory_space<vmem>>, %arg5: memref<128x128xf32, #tpu.memory_space<vmem>>, %arg6: memref<128x128xf32, #tpu.memory_space<vmem>>, %arg7: memref<1x128xf32, #tpu.memory_space<vmem>>, %arg8: memref<8x128xf32, #tpu.memory_space<vmem>>) attributes {dimension_semantics = [#tpu.dimension_semantics<parallel>], iteration_bounds = array<i64: 1>, scalar_prefetch = 0 : i64, scratch_operands = 0 : i64, tpu.core_type = #tpu.core_type<tc>, window_params = [{transform_indices = @transform_0, window_bounds = array<i64: 8, 128>}, {transform_indices = @transform_1, window_bounds = array<i64: 8, 128>}, {transform_indices = @transform_2, window_bounds = array<i64: 8, 128>}, {pipeline_mode = #tpu.pipeline_mode<synchronous>, transform_indices = @transform_3, window_bounds = array<i64: 128, 128>}, {pipeline_mode = #tpu.pipeline_mode<synchronous>, transform_indices = @transform_4, window_bounds = array<i64: 128, 128>}, {pipeline_mode = #tpu.pipeline_mode<synchronous>, transform_indices = @transform_5, window_bounds = array<i64: 128, 128>}, {pipeline_mode = #tpu.pipeline_mode<synchronous>, transform_indices = @transform_6, window_bounds = array<i64: 1, 128>}, {transform_indices = @transform_7, window_bounds = array<i64: 8, 128>}]} {
    %c0 = arith.constant 0 : index
    %c0_0 = arith.constant 0 : index
    %0 = vector.load %arg1[%c0, %c0_0] : memref<8x128xf32, #tpu.memory_space<vmem>>, vector<8x128xf32>
    %c0_1 = arith.constant 0 : index
    %c0_2 = arith.constant 0 : index
    %1 = vector.load %arg4[%c0_1, %c0_2] : memref<128x128xf32, #tpu.memory_space<vmem>>, vector<128x128xf32>
    %cst = arith.constant dense<0.000000e+00> : vector<8x128xf32>
    %2 = tpu.matmul %0, %1, %cst {dimension_numbers = #tpu.dot_dimension_numbers<[1], [0], [0], [1], [0, 0, 1, 1], [], []>} : vector<8x128xf32>, vector<128x128xf32>, vector<8x128xf32> -> vector<8x128xf32>
    %c0_3 = arith.constant 0 : index
    %c0_4 = arith.constant 0 : index
    %3 = vector.load %arg2[%c0_3, %c0_4] : memref<8x128xf32, #tpu.memory_space<vmem>>, vector<8x128xf32>
    %c0_5 = arith.constant 0 : index
    %c0_6 = arith.constant 0 : index
    %4 = vector.load %arg5[%c0_5, %c0_6] : memref<128x128xf32, #tpu.memory_space<vmem>>, vector<128x128xf32>
    %cst_7 = arith.constant dense<0.000000e+00> : vector<8x128xf32>
    %5 = tpu.matmul %3, %4, %cst_7 {dimension_numbers = #tpu.dot_dimension_numbers<[1], [0], [0], [1], [0, 0, 1, 1], [], []>} : vector<8x128xf32>, vector<128x128xf32>, vector<8x128xf32> -> vector<8x128xf32>
    %6 = arith.addf %2, %5 : vector<8x128xf32>
    %c0_8 = arith.constant 0 : index
    %c0_9 = arith.constant 0 : index
    %7 = vector.load %arg3[%c0_8, %c0_9] : memref<8x128xf32, #tpu.memory_space<vmem>>, vector<8x128xf32>
    %c0_10 = arith.constant 0 : index
    %c0_11 = arith.constant 0 : index
    %8 = vector.load %arg6[%c0_10, %c0_11] : memref<128x128xf32, #tpu.memory_space<vmem>>, vector<128x128xf32>
    %cst_12 = arith.constant dense<0.000000e+00> : vector<8x128xf32>
    %9 = tpu.matmul %7, %8, %cst_12 {dimension_numbers = #tpu.dot_dimension_numbers<[1], [0], [0], [1], [0, 0, 1, 1], [], []>} : vector<8x128xf32>, vector<128x128xf32>, vector<8x128xf32> -> vector<8x128xf32>
    %10 = arith.addf %6, %9 : vector<8x128xf32>
    %c0_13 = arith.constant 0 : index
    %c0_14 = arith.constant 0 : index
    %11 = vector.load %arg7[%c0_13, %c0_14] : memref<1x128xf32, #tpu.memory_space<vmem>>, vector<1x128xf32>
    %12 = vector.broadcast %11 : vector<1x128xf32> to vector<8x128xf32>
    %13 = arith.addf %10, %12 : vector<8x128xf32>
    %cst_15 = arith.constant 0.000000e+00 : f32
    %14 = vector.broadcast %cst_15 : f32 to vector<8x128xf32>
    %15 = arith.maximumf %13, %14 : vector<8x128xf32>
    %c0_16 = arith.constant 0 : index
    %c0_17 = arith.constant 0 : index
    %16 = vector.load %arg8[%c0_16, %c0_17] : memref<8x128xf32, #tpu.memory_space<vmem>>, vector<8x128xf32>
    tpu.vector_store %arg8[%c0_16, %c0_17], %15 {strides = array<i32>} : memref<8x128xf32, #tpu.memory_space<vmem>>, vector<8x128xf32>,
    return
  }
  func.func @transform_0(%arg0: i32) -> (i32, i32) {
    %c0_i32 = arith.constant 0 : i32
    %c0_i32_0 = arith.constant 0 : i32
    return %arg0, %c0_i32 : i32, i32
  }
  func.func @transform_1(%arg0: i32) -> (i32, i32) {
    %c0_i32 = arith.constant 0 : i32
    %c0_i32_0 = arith.constant 0 : i32
    return %arg0, %c0_i32 : i32, i32
  }
  func.func @transform_2(%arg0: i32) -> (i32, i32) {
    %c0_i32 = arith.constant 0 : i32
    %c0_i32_0 = arith.constant 0 : i32
    return %arg0, %c0_i32 : i32, i32
  }
  func.func @transform_3(%arg0: i32) -> (i32, i32) {
    %c0_i32 = arith.constant 0 : i32
    %c0_i32_0 = arith.constant 0 : i32
    %c0_i32_1 = arith.constant 0 : i32
    return %c0_i32, %c0_i32_0 : i32, i32
  }
  func.func @transform_4(%arg0: i32) -> (i32, i32) {
    %c0_i32 = arith.constant 0 : i32
    %c0_i32_0 = arith.constant 0 : i32
    %c0_i32_1 = arith.constant 0 : i32
    return %c0_i32, %c0_i32_0 : i32, i32
  }
  func.func @transform_5(%arg0: i32) -> (i32, i32) {
    %c0_i32 = arith.constant 0 : i32
    %c0_i32_0 = arith.constant 0 : i32
    %c0_i32_1 = arith.constant 0 : i32
    return %c0_i32, %c0_i32_0 : i32, i32
  }
  func.func @transform_6(%arg0: i32) -> (i32, i32) {
    %c0_i32 = arith.constant 0 : i32
    %c0_i32_0 = arith.constant 0 : i32
    %c0_i32_1 = arith.constant 0 : i32
    return %c0_i32, %c0_i32_0 : i32, i32
  }
  func.func @transform_7(%arg0: i32) -> (i32, i32) {
    %c0_i32 = arith.constant 0 : i32
    %c0_i32_0 = arith.constant 0 : i32
    return %arg0, %c0_i32 : i32, i32
  }
}

</mosaic_0001>

<bundles_post_ra>
// kernel: tpu_custom_call.1
= control target key start
LH: loop header
LB: loop body
LE: loop exit
PB: predicated region body
PF: predicated region fallthrough
CT: control target
= control target key end

     0   :  { %12 = vsyncpa [#allocation3], 0  ;;  %s990_s0 = inlined_call_operand.hbm [shape: f32[8,128], index: 0, kind: input, shape index: {}]   ;;  %s991_s1 = inlined_call_operand.hbm [shape: f32[8,128], index: 1, kind: input, shape index: {}]   ;;  %s992_s2 = inlined_call_operand.hbm [shape: f32[8,128], index: 2, kind: input, shape index: {}]   ;;  %s993_s3 = inlined_call_operand.hbm [shape: f32[128,128], index: 3, kind: input, shape index: {}]   ;;  %s994_s4 = inlined_call_operand.hbm [shape: f32[128,128], index: 4, kind: input, shape index: {}]   ;;  %s995_s5 = inlined_call_operand.hbm [shape: f32[128,128], index: 5, kind: input, shape index: {}]   ;;  %s996_s6 = inlined_call_operand.vmem [shape: f32[1,128], index: 6, kind: input, shape index: {}]   ;;  %s997_s7 = inlined_call_operand.hbm [shape: f32[8,128], index: 7, kind: output, shape index: {}]  }
   0x1   :  { %13 = vsyncpa [#allocation6], 0 }
   0x2   :  { %14 = vsyncpa [#allocation9], 0 }
   0x3   :  { %15 = vsyncpa [#allocation12], 0 }
   0x4   :  { %16 = vsyncpa [#allocation4], 0  ;;  %s798_s24 = smov [#allocation5]   ;;  %s799_s26 = smov [#allocation8]  }
   0x5   :  { %s33_s25 = sshll.u32 %s798_s24, 4  ;;  %s52_s27 = sshll.u32 %s799_s26, 4  ;;  %s34_s25 = int_to_ptr.vmem [resolvable:$true] %s33_s25  ;;  %s850_s27 = int_to_ptr.vmem [resolvable:$true] %s52_s27 }
   0x6   :  { %s634_s30 = scalar_lea.hbm %s991_s1, 128 }
   0x7   :  { %p635_p0 = scmp.ne.s32.totalorder %s991_s1, %s634_s30  ;;  %p638_p1 = scmp.lt.u32.totalorder %s634_s30, %s991_s1 }
   0x9   :  { %p640_p2 = pnand %p638_p1, %p635_p0 }
   0xb   :  { %643 = shalt.err (!%p640_p2)
}
   0xc   :  { %s644_s12 = scalar_lea.vmem %s34_s25, 128  ;;  %p649_p4 = scmp.lt.s32.totalorder %s34_s25, %s34_s25 }
   0xd   :  { %p645_p3 = scmp.ne.s32.totalorder %s34_s25, %s644_s12  ;;  %p650_p5 = scmp.lt.s32.totalorder %s644_s12, %s644_s12 }
   0xf   :  { %p651_p6 = por %p650_p5, %p649_p4 }
  0x11   :  { %p652_p7 = pnand %p651_p6, %p645_p3 }
  0x13   :  { %655 = shalt.err (!%p652_p7)
}
  0x14   :  { %36 = dma.hbm_to_vmem [thread:$0]  %s991_s1, 128, %s34_s25, [#allocation6]  }
  0x15   :  { %s656_s17 = scalar_lea.hbm %s993_s3, 2048 }
  0x16   :  { %p657_p8 = scmp.ne.s32.totalorder %s993_s3, %s656_s17  ;;  %p660_p9 = scmp.lt.u32.totalorder %s656_s17, %s993_s3 }
  0x18   :  { %p662_p10 = pnand %p660_p9, %p657_p8 }
  0x1a   :  { %665 = shalt.err (!%p662_p10)
}
  0x1b   :  { %s666_s22 = scalar_lea.vmem %s850_s27, 2048  ;;  %p671_p12 = scmp.lt.s32.totalorder %s850_s27, %s850_s27 }
  0x1c   :  { %p667_p11 = scmp.ne.s32.totalorder %s850_s27, %s666_s22  ;;  %p672_p13 = scmp.lt.s32.totalorder %s666_s22, %s666_s22 }
  0x1e   :  { %p673_p0 = por %p672_p13, %p671_p12 }
  0x20   :  { %p674_p1 = pnand %p673_p0, %p667_p11 }
  0x22   :  { %677 = shalt.err (!%p674_p1)
}
  0x23   :  { %s800_s1 = smov 128   ;;  %s801_s23 = smov 8  }
  0x24   :  { %58 = dma.hbm_to_vmem [thread:$0]  %s993_s3, 2048, %s850_s27, [#allocation9], %s800_s1, %s800_s1, %s801_s23  }
  0x25   :  { %s802_s26 = smov [#allocation2]   ;;  %s803_s29 = smov [#allocation7]  }
  0x26   :  { %s23_s28 = sshll.u32 %s802_s26, 4  ;;  %s43_s30 = sshll.u32 %s803_s29, 4  ;;  %s24_s28 = int_to_ptr.vmem [resolvable:$true] %s23_s28  ;;  %s44_s30 = int_to_ptr.vmem [resolvable:$true] %s43_s30 }
  0x27   :  { %s678_s10 = scalar_lea.hbm %s990_s0, 128 }
  0x28   :  { %p679_p2 = scmp.ne.s32.totalorder %s990_s0, %s678_s10  ;;  %p682_p3 = scmp.lt.u32.totalorder %s678_s10, %s990_s0 }
  0x2a   :  { %p684_p4 = pnand %p682_p3, %p679_p2 }
  0x2c   :  { %687 = shalt.err (!%p684_p4)
}
  0x2d   :  { %s688_s3 = scalar_lea.vmem %s24_s28, 128  ;;  %p693_p6 = scmp.lt.s32.totalorder %s24_s28, %s24_s28 }
  0x2e   :  { %p689_p5 = scmp.ne.s32.totalorder %s24_s28, %s688_s3  ;;  %p694_p7 = scmp.lt.s32.totalorder %s688_s3, %s688_s3 }
  0x30   :  { %p695_p8 = por %p694_p7, %p693_p6 }
  0x32   :  { %p696_p9 = pnand %p695_p8, %p689_p5 }
  0x34   :  { %699 = shalt.err (!%p696_p9)
}
  0x35   :  { %26 = dma.hbm_to_vmem [thread:$0]  %s990_s0, 128, %s24_s28, [#allocation3]  }
  0x36   :  { %s700_s18 = scalar_lea.hbm %s992_s2, 128 }
  0x37   :  { %p701_p10 = scmp.ne.s32.totalorder %s992_s2, %s700_s18  ;;  %p704_p11 = scmp.lt.u32.totalorder %s700_s18, %s992_s2 }
  0x39   :  { %p706_p12 = pnand %p704_p11, %p701_p10 }
  0x3b   :  { %709 = shalt.err (!%p706_p12)
}
  0x3c   :  { %s710_s24 = scalar_lea.vmem %s44_s30, 128  ;;  %p715_p0 = scmp.lt.s32.totalorder %s44_s30, %s44_s30 }
  0x3d   :  { %p711_p13 = scmp.ne.s32.totalorder %s44_s30, %s710_s24  ;;  %p716_p1 = scmp.lt.s32.totalorder %s710_s24, %s710_s24 }
  0x3f   :  { %p717_p2 = por %p716_p1, %p715_p0 }
  0x41   :  { %p718_p3 = pnand %p717_p2, %p711_p13 }
  0x43   :  { %721 = shalt.err (!%p718_p3)
}
  0x44   :  { %46 = dma.hbm_to_vmem [thread:$0]  %s992_s2, 128, %s44_s30, [#allocation6]  }
  0x45   :  { %s804_s26 = smov [#allocation10]   ;;  %s805_s29 = smov [#allocation11]  }
  0x46   :  { %s64_s28 = sshll.u32 %s804_s26, 4  ;;  %s76_s8 = sshll.u32 %s805_s29, 4  ;;  %s65_s28 = int_to_ptr.vmem [resolvable:$true] %s64_s28  ;;  %s908_s8 = int_to_ptr.vmem [resolvable:$true] %s76_s8 }
  0x47   :  { %s722_s11 = scalar_lea.hbm %s994_s4, 2048 }
  0x48   :  { %p723_p4 = scmp.ne.s32.totalorder %s994_s4, %s722_s11  ;;  %p726_p5 = scmp.lt.u32.totalorder %s722_s11, %s994_s4 }
  0x4a   :  { %p728_p6 = pnand %p726_p5, %p723_p4 }
  0x4c   :  { %731 = shalt.err (!%p728_p6)
}
  0x4d   :  { %s732_s2 = scalar_lea.vmem %s65_s28, 2048  ;;  %p737_p8 = scmp.lt.s32.totalorder %s65_s28, %s65_s28 }
  0x4e   :  { %p733_p7 = scmp.ne.s32.totalorder %s65_s28, %s732_s2  ;;  %p738_p9 = scmp.lt.s32.totalorder %s732_s2, %s732_s2 }
  0x50   :  { %p739_p10 = por %p738_p9, %p737_p8 }
  0x52   :  { %p740_p11 = pnand %p739_p10, %p733_p7 }
  0x54   :  { %743 = shalt.err (!%p740_p11)
}
  0x55   :  { %70 = dma.hbm_to_vmem [thread:$0]  %s994_s4, 2048, %s65_s28, [#allocation9], %s800_s1, %s800_s1, %s801_s23  }
  0x56   :  { %s744_s17 = scalar_lea.hbm %s995_s5, 2048 }
  0x57   :  { %p745_p12 = scmp.ne.s32.totalorder %s995_s5, %s744_s17  ;;  %p748_p13 = scmp.lt.u32.totalorder %s744_s17, %s995_s5 }
  0x59   :  { %p750_p0 = pnand %p748_p13, %p745_p12 }
  0x5b   :  { %753 = shalt.err (!%p750_p0)
}
  0x5c   :  { %s754_s22 = scalar_lea.vmem %s908_s8, 2048  ;;  %p759_p2 = scmp.lt.s32.totalorder %s908_s8, %s908_s8 }
  0x5d   :  { %p755_p1 = scmp.ne.s32.totalorder %s908_s8, %s754_s22  ;;  %p760_p3 = scmp.lt.s32.totalorder %s754_s22, %s754_s22 }
  0x5f   :  { %p761_p4 = por %p760_p3, %p759_p2 }
  0x61   :  { %p762_p5 = pnand %p761_p4, %p755_p1 }
  0x63   :  { %765 = shalt.err (!%p762_p5)
}
  0x64   :  { %82 = dma.hbm_to_vmem [thread:$0]  %s995_s5, 2048, %s908_s8, [#allocation12], %s800_s1, %s800_s1, %s801_s23  }
  0x65   :  { %788 = dma.done.wait [#allocation3], 128  }
  0x66   :  { %789 = vsyncadd [#allocation3], 4294967168 }
  0x67   :  { %790 = dma.done.wait [#allocation6], 256  }
  0x68   :  { %791 = vsyncadd [#allocation6], 4294967040 }
  0x69   :  { %792 = dma.done.wait [#allocation9], 4096  }
  0x6a   :  { %793 = vsyncadd [#allocation9], 4294963200 }
  0x6b   :  { %794 = dma.done.wait [#allocation12], 2048  }
  0x6c   :  { %795 = vsyncadd [#allocation12], 4294965248  ;;  %v806_v0 = vmov 0.0|0.0   ;;  %vm807_vm0 = vmmov 0   ;;  %v808_v1 = vmov 0.0   ;;  %v121_v2 = vld [vmem:[#allocation10] sm:$0xff] }
  0x6d   :  { %550 = vmatprep.subr.bf16.mxu0 %v806_v0  ;;  %574 = vmatprep.subr.bf16.mxu1 %v806_v0  ;;  %v122_v3 = vld [vmem:[#allocation10 + $0x8] sm:$0xff]  ;;  %v104_v4 = vld [vmem:[#allocation8] sm:$0xff]  ;;  %v123_v7 = vld [vmem:[#allocation10 + $0x10] sm:$0xff]  ;;  %s809_s23 = smov [#allocation13]  }
  0x6e   :  { %477 = vmatprep.mubr.msk.f32.mxu0 %vm807_vm0, %v808_v1  ;;  %512 = vmatprep.mubr.msk.f32.mxu1 %vm807_vm0, %v808_v1  ;;  %v551_v5 = vpack.c.bf16 %v122_v3, %v121_v2  ;;  %v105_v6 = vld [vmem:[#allocation8 + $0x8] sm:$0xff]  ;;  %v124_v8 = vld [vmem:[#allocation10 + $0x18] sm:$0xff]  ;;  %v106_v10 = vld [vmem:[#allocation8 + $0x10] sm:$0xff]  ;;  %s381_s0 = sshll.u32 %s809_s23, 4  ;;  %s382_s0 = int_to_ptr.vmem [resolvable:$true] %s381_s0 }
  0x6f   :  { %v575_v9 = vpack.c.bf16 %v105_v6, %v104_v4  ;;  %v107_v11 = vld [vmem:[#allocation8 + $0x18] sm:$0xff]  ;;  %v554_v12 = vpack.c.bf16 %v124_v8, %v123_v7  ;;  %v125_v14 = vld [vmem:[#allocation10 + $0x20] sm:$0xff]  ;;  %v126_v15 = vld [vmem:[#allocation10 + $0x28] sm:$0xff]  ;;  %s766_s25 = scalar_lea.vmem %s382_s0, 128  ;;  %p771_p7 = scmp.lt.s32.totalorder %s382_s0, %s382_s0 }
  0x70   :  { %552 = vmatpush3.bf16.msra.mxu0 %v551_v5  ;;  %v578_v13 = vpack.c.bf16 %v107_v11, %v106_v10  ;;  %v108_v16 = vld [vmem:[#allocation8 + $0x20] sm:$0xff]  ;;  %v109_v17 = vld [vmem:[#allocation8 + $0x28] sm:$0xff]  ;;  %v557_v18 = vpack.c.bf16 %v126_v15, %v125_v14  ;;  %v127_v20 = vld [vmem:[#allocation10 + $0x30] sm:$0xff]  ;;  %p767_p6 = scmp.ne.s32.totalorder %s382_s0, %s766_s25  ;;  %p772_p8 = scmp.lt.s32.totalorder %s766_s25, %s766_s25 }
  0x71   :  { %576 = vmatpush3.bf16.msra.mxu1 %v575_v9  ;;  %553 = vmatprep.subr.bf16.mxu0 %v806_v0  ;;  %v581_v19 = vpack.c.bf16 %v109_v17, %v108_v16  ;;  %v128_v21 = vld [vmem:[#allocation10 + $0x38] sm:$0xff]  ;;  %v110_v22 = vld [vmem:[#allocation8 + $0x30] sm:$0xff]  ;;  %v129_v26 = vld [vmem:[#allocation10 + $0x40] sm:$0xff] }
  0x72   :  { %577 = vmatprep.subr.bf16.mxu1 %v806_v0  ;;  %v111_v23 = vld [vmem:[#allocation8 + $0x38] sm:$0xff]  ;;  %v560_v24 = vpack.c.bf16 %v128_v21, %v127_v20  ;;  %v130_v27 = vld [vmem:[#allocation10 + $0x48] sm:$0xff]  ;;  %v112_v28 = vld [vmem:[#allocation8 + $0x40] sm:$0xff]  ;;  %p773_p9 = por %p772_p8, %p771_p7 }
  0x73   :  { %v584_v25 = vpack.c.bf16 %v111_v23, %v110_v22  ;;  %v113_v29 = vld [vmem:[#allocation8 + $0x48] sm:$0xff]  ;;  %v563_v30 = vpack.c.bf16 %v130_v27, %v129_v26  ;;  %v131_v32 = vld [vmem:[#allocation10 + $0x50] sm:$0xff]  ;;  %v132_v33 = vld [vmem:[#allocation10 + $0x58] sm:$0xff] }
  0x74   :  { %555 = vmatpush3.bf16.msra.mxu0 %v554_v12  ;;  %v587_v31 = vpack.c.bf16 %v113_v29, %v112_v28  ;;  %v114_v34 = vld [vmem:[#allocation8 + $0x50] sm:$0xff]  ;;  %v115_v35 = vld [vmem:[#allocation8 + $0x58] sm:$0xff]  ;;  %v566_v36 = vpack.c.bf16 %v132_v33, %v131_v32  ;;  %v133_v38 = vld [vmem:[#allocation10 + $0x60] sm:$0xff]  ;;  %p774_p10 = pnand %p773_p9, %p767_p6 }
  0x75   :  { %579 = vmatpush3.bf16.msra.mxu1 %v578_v13  ;;  %556 = vmatprep.subr.bf16.mxu0 %v806_v0  ;;  %v590_v37 = vpack.c.bf16 %v115_v35, %v114_v34  ;;  %v134_v39 = vld [vmem:[#allocation10 + $0x68] sm:$0xff]  ;;  %v116_v40 = vld [vmem:[#allocation8 + $0x60] sm:$0xff]  ;;  %v135_v44 = vld [vmem:[#allocation10 + $0x70] sm:$0xff] }
  0x76   :  { %580 = vmatprep.subr.bf16.mxu1 %v806_v0  ;;  %v117_v41 = vld [vmem:[#allocation8 + $0x68] sm:$0xff]  ;;  %v569_v42 = vpack.c.bf16 %v134_v39, %v133_v38  ;;  %v136_v45 = vld [vmem:[#allocation10 + $0x78] sm:$0xff]  ;;  %v118_v46 = vld [vmem:[#allocation8 + $0x70] sm:$0xff] }
  0x77   :  { %v593_v43 = vpack.c.bf16 %v117_v41, %v116_v40  ;;  %v119_v47 = vld [vmem:[#allocation8 + $0x78] sm:$0xff]  ;;  %v572_v48 = vpack.c.bf16 %v136_v45, %v135_v44  ;;  %v278_v50 = vld [vmem:[#allocation11] sm:$0xff]  ;;  %v279_v51 = vld [vmem:[#allocation11 + $0x8] sm:$0xff] }
  0x78   :  { %558 = vmatpush3.bf16.msra.mxu0 %v557_v18  ;;  %v596_v49 = vpack.c.bf16 %v119_v47, %v118_v46  ;;  %v120_v52 = vld [vmem:[#allocation5] sm:$0xff]  ;;  %v599_v53 = vpack.c.bf16 %v279_v51, %v278_v50  ;;  %v103_v54 = vld [vmem:[#allocation2] sm:$0xff]  ;;  %v281_v56 = vld [vmem:[#allocation11 + $0x18] sm:$0xff] }
  0x79   :  { %582 = vmatpush3.bf16.msra.mxu1 %v581_v19  ;;  %559 = vmatprep.subr.bf16.mxu0 %v806_v0  ;;  %v280_v55 = vld [vmem:[#allocation11 + $0x10] sm:$0xff]  ;;  %v282_v58 = vld [vmem:[#allocation11 + $0x20] sm:$0xff]  ;;  %v283_v59 = vld [vmem:[#allocation11 + $0x28] sm:$0xff] }
  0x7a   :  { %583 = vmatprep.subr.bf16.mxu1 %v806_v0  ;;  %v602_v57 = vpack.c.bf16 %v281_v56, %v280_v55  ;;  %v605_v60 = vpack.c.bf16 %v283_v59, %v282_v58  ;;  %v284_v61 = vld [vmem:[#allocation11 + $0x30] sm:$0xff]  ;;  %v285_v62 = vld [vmem:[#allocation11 + $0x38] sm:$0xff]  ;;  %v286_v2 = vld [vmem:[#allocation11 + $0x40] sm:$0xff] }
  0x7b   :  { %v608_v63 = vpack.c.bf16 %v285_v62, %v284_v61  ;;  %v287_v3 = vld [vmem:[#allocation11 + $0x48] sm:$0xff]  ;;  %v288_v5 = vld [vmem:[#allocation11 + $0x50] sm:$0xff]  ;;  %v289_v6 = vld [vmem:[#allocation11 + $0x58] sm:$0xff] }
  0x7c   :  { %561 = vmatpush3.bf16.msra.mxu0 %v560_v24  ;;  %v611_v4 = vpack.c.bf16 %v287_v3, %v286_v2  ;;  %v290_v7 = vld [vmem:[#allocation11 + $0x60] sm:$0xff]  ;;  %v291_v8 = vld [vmem:[#allocation11 + $0x68] sm:$0xff]  ;;  %v292_v10 = vld [vmem:[#allocation11 + $0x70] sm:$0xff] }
  0x7d   :  { %585 = vmatpush3.bf16.msra.mxu1 %v584_v25  ;;  %562 = vmatprep.subr.bf16.mxu0 %v806_v0  ;;  %v617_v9 = vpack.c.bf16 %v291_v8, %v290_v7  ;;  %v293_v11 = vld [vmem:[#allocation11 + $0x78] sm:$0xff]  ;;  %v393_v20 = vld [vmem:[%s996_s6] ss:$0 sm:$0xff] }
  0x7e   :  { %586 = vmatprep.subr.bf16.mxu1 %v806_v0  ;;  %v620_v12 = vpack.c.bf16 %v293_v11, %v292_v10  ;;  %v277_v13 = vld [vmem:[#allocation7] sm:$0xff] }
  0x80   :  { %564 = vmatpush3.bf16.msra.mxu0 %v563_v30 }
  0x81   :  { %588 = vmatpush3.bf16.msra.mxu1 %v587_v31  ;;  %565 = vmatprep.subr.bf16.mxu0 %v806_v0 }
  0x82   :  { %589 = vmatprep.subr.bf16.mxu1 %v806_v0 }
  0x84   :  { %567 = vmatpush3.bf16.msra.mxu0 %v566_v36 }
  0x85   :  { %591 = vmatpush3.bf16.msra.mxu1 %v590_v37  ;;  %568 = vmatprep.subr.bf16.mxu0 %v806_v0 }
  0x86   :  { %592 = vmatprep.subr.bf16.mxu1 %v806_v0 }
  0x88   :  { %570 = vmatpush3.bf16.msra.mxu0 %v569_v42 }
  0x89   :  { %594 = vmatpush3.bf16.msra.mxu1 %v593_v43  ;;  %571 = vmatprep.subr.bf16.mxu0 %v806_v0 }
  0x8a   :  { %595 = vmatprep.subr.bf16.mxu1 %v806_v0 }
  0x8c   :  { %573 = vmatpush3.bf16.msra.mxu0 %v572_v48 }
  0x8d   :  { %597 = vmatpush3.bf16.msra.mxu1 %v596_v49  ;;  %598 = vmatprep.subr.bf16.mxu0 %v806_v0 }
  0x8f   :  { %478 = vmatmul.mubr.f32.vlgmr.msra.gmra.mrb[0].mxu0 %v120_v52 }
  0x90   :  { %513 = vmatmul.mubr.f32.vlgmr.msra.gmra.mrb[0].mxu1 %v103_v54  ;;  %600 = vmatpush3.bf16.msra.mxu0 %v599_v53 }
  0x91   :  { %601 = vmatprep.subr.bf16.mxu0 %v806_v0  ;;  %547 = vmatprep.mubr.msk.f32.mxu0 %vm807_vm0, %v808_v1  ;;  %v614_v1 = vpack.c.bf16 %v289_v6, %v288_v5 }
  0x94   :  { %603 = vmatpush3.bf16.msra.mxu0 %v602_v57 }
  0x95   :  { %604 = vmatprep.subr.bf16.mxu0 %v806_v0 }
  0x98   :  { %606 = vmatpush3.bf16.msra.mxu0 %v605_v60 }
  0x99   :  { %607 = vmatprep.subr.bf16.mxu0 %v806_v0 }
  0x9c   :  { %609 = vmatpush3.bf16.msra.mxu0 %v608_v63 }
  0x9d   :  { %610 = vmatprep.subr.bf16.mxu0 %v806_v0 }
  0xa0   :  { %612 = vmatpush3.bf16.msra.mxu0 %v611_v4 }
  0xa1   :  { %613 = vmatprep.subr.bf16.mxu0 %v806_v0 }
  0xa4   :  { %615 = vmatpush3.bf16.msra.mxu0 %v614_v1 }
  0xa5   :  { %616 = vmatprep.subr.bf16.mxu0 %v806_v0 }
  0xa8   :  { %618 = vmatpush3.bf16.msra.mxu0 %v617_v9 }
  0xa9   :  { %619 = vmatprep.subr.bf16.mxu0 %v806_v0 }
  0xac   :  { %621 = vmatpush3.bf16.msra.mxu0 %v620_v12 }
  0xaf   :  { %548 = vmatmul.mubr.f32.vlgmr.msra.gmra.mrb[2].mxu0 %v277_v13 }
 0x162   :  { %v203_v14 = vpop.f32.mrb[0].mxu0 }
 0x163   :  { %v479_v15 = vpop.f32.mrb[1].mxu0  ;;  %v273_v16 = vpop.f32.mrb[0].mxu1 }
 0x164   :  { %v274_v17 = vadd.f32 %v273_v16, %v203_v14  ;;  %v514_v18 = vpop.f32.mrb[1].mxu1 }
 0x182   :  { %v360_v19 = vpop.f32.mrb[2].mxu0 }
 0x183   :  { %v364_v21 = vadd.f32 %v360_v19, %v274_v17  ;;  %v549_v22 = vpop.f32.mrb[3].mxu0 }
 0x185   :  { %v372_v23 = vadd.f32 %v393_v20, %v364_v21 }
 0x187   :  { %v373_v24 = vmax.f32 %v372_v23, 0.0 }
 0x189   :  { %374 = vst [vmem:[#allocation13] sm:$0xff] %v373_v24 }
 0x18a   :  { %777 = shalt.err (!%p774_p10)
}
 0x18b   :  { %s778_s29 = scalar_lea.hbm %s997_s7, 128 }
 0x18c   :  { %p779_p11 = scmp.ne.s32.totalorder %s997_s7, %s778_s29  ;;  %p782_p12 = scmp.lt.u32.totalorder %s778_s29, %s997_s7 }
 0x18e   :  { %p784_p13 = pnand %p782_p12, %p779_p11 }
 0x190   :  { %787 = shalt.err (!%p784_p13)
}
 0x191   :  { %384 = dma.vmem_to_hbm [thread:$0]  %s382_s0, 128, %s997_s7, [#allocation4]  }
 0x192   :  { %796 = dma.done.wait [#allocation4], 128  }
 0x193   :  { %797 = vsyncadd [#allocation4], 4294967168 }
 0x194   :  { %388 = vsyncpa [#allocation3], 1 }
 0x195   :  { %389 = vsyncpa [#allocation6], 1 }
 0x196   :  { %390 = vsyncpa [#allocation9], 1 }
 0x197   :  { %391 = vsyncpa [#allocation12], 1 }
 0x198   :  { %392 = vsyncpa [#allocation4], 1 }

</bundles_post_ra>
